<compile_context>
chip_gen: v7x
topology: tpu7x:2x2x1
jax: 0.10.0
libtpu: 0.0.40
codegen_flags: <defaults>
</compile_context>

<pallas_src>
import functools

import jax
import jax.numpy as jnp
import numpy as np
from jax import lax
from jax.experimental import pallas as pl
from jax.experimental.pallas import tpu as pltpu


# ---------------------------------------------------------------------------
# small helpers
# ---------------------------------------------------------------------------

def _round_up(x: int, m: int) -> int:
    return ((x + m - 1) // m) * m


def _device_kind() -> str:
    try:
        return jax.devices()[0].device_kind.lower()
    except Exception:
        return ""


def _is_v5e() -> bool:
    kind = _device_kind()
    return ("v5 lite" in kind) or ("v5e" in kind) or ("v5lite" in kind)


def _default_max_q_tile() -> int:
    # v6e/v7x MXU tiles are 256 wide; v5e is 128 wide with tighter vreg/VMEM
    # budgets, so keep its q tile at <= 128.
    return 128 if _is_v5e() else 256


def _pick_q_tile(n: int, max_q_tile: int) -> int:
    if n <= max_q_tile:
        return _round_up(n, 8)             # single (8-aligned) tile
    for cand in (256, 128, 64, 32, 16, 8):
        if cand <= max_q_tile and n % cand == 0:
            return cand                    # exact divisor -> no padding needed
    return min(128, max_q_tile)            # fallback: pad N up to this tile


def _pick_row_tile(n_pad: int) -> int:
    # K|V-projection row chunk; 256-512 rows bounds the f32 matmul intermediate.
    if n_pad <= 512:
        return n_pad
    for cand in (512, 256, 128, 64, 32, 16, 8):
        if n_pad % cand == 0:
            return cand
    return n_pad


def _vmem_limit(nbytes: int) -> int:
    # Headroom for spills / compiler-internal scratch; floor so tiny demo
    # shapes do not starve the compiler, ceiling below physical VMEM.
    return int(max(24 << 20, min(int(1.3 * nbytes) + (4 << 20), 100 << 20)))


# ---------------------------------------------------------------------------
# kernels
# ---------------------------------------------------------------------------

def _kv_proj_kernel(x_ref, wkv_ref, kv_ref):
    # (r_tile, C) @ (C, 2C): C-deep MXU matmul, f32 accumulation, store in the
    # input dtype.  Row chunking keeps the f32 result to ~1-2 MB.
    kv = jnp.dot(x_ref[...], wkv_ref[...], preferred_element_type=jnp.float32)
    kv_ref[...] = kv.astype(kv_ref.dtype)


def _attn_kernel(x_ref, wq_ref, kv_ref, wproj_ref, bproj_ref, o_ref,
                 q_scr, att_scr, *, num_heads: int, head_dim: int, scale: float,
                 n_valid: int, bf16_softmax: bool, approx_recip: bool):
    C = num_heads * head_dim
    cdt = q_scr.dtype                      # MXU operand dtype (= input dtype)
    n_pad = kv_ref.shape[0]

    # Fused Q projection for this query tile; softmax scale folded here (tq*C
    # VPU multiplies, hidden under the MXU matmul).  Staged into VMEM so the
    # per-head 64-lane slices below are ld-slot reads, not register relayouts.
    q = jnp.dot(x_ref[...], wq_ref[...], preferred_element_type=jnp.float32)
    q_scr[...] = (q * scale).astype(cdt)

    for h in range(num_heads):
        lo = h * head_dim
        qh = q_scr[:, lo:lo + head_dim]                 # (tq, hd)
        kh = kv_ref[:, lo:lo + head_dim]                # (n_pad, hd)
        vh = kv_ref[:, C + lo:C + lo + head_dim]        # (n_pad, hd)

        # QK^T via dot_general contracting head_dim on both sides (no k.T).
        s = lax.dot_general(qh, kh, (((1,), (1,)), ((), ())),
                            preferred_element_type=jnp.float32)   # (tq, n_pad)

        if n_valid < n_pad:   # static: mask padded key columns out of softmax
            kidx = lax.broadcasted_iota(jnp.int32, s.shape, 1)
            s = jnp.where(kidx < n_valid, s, -1e30)

        # Softmax statistics; max/sum/reciprocal stay in f32.
        m = jnp.max(s, axis=-1, keepdims=True)
        if bf16_softmax:
            # bf16 EUP exp (v6e/v7x): ~2x exp throughput and halves p's live
            # footprint; the row sum still accumulates in f32.
            p = jnp.exp((s - m).astype(jnp.bfloat16))
            l = jnp.sum(p, axis=-1, keepdims=True, dtype=jnp.float32)
        else:
            p = jnp.exp(s - m)
            l = jnp.sum(p, axis=-1, keepdims=True)
            p = p.astype(cdt)
        # Normalization applied to the small (tq, hd) head output.  With
        # approx=True the EUP reciprocal adds ~2^-12 relative error per row
        # (intentional on the bf16 path).
        inv_l = pl.reciprocal(l, approx=approx_recip)

        oh = jnp.dot(p, vh, preferred_element_type=jnp.float32)   # (tq, hd) f32
        # Per-head store at a static 64-lane offset (bounds live ranges, keeps
        # the projection operand lane-dense; replaces jnp.concatenate).
        att_scr[:, lo:lo + head_dim] = (oh * inv_l).astype(cdt)

    # Fused output projection (+ bias): C-deep contraction, lane-dense store.
    out = jnp.dot(att_scr[...], wproj_ref[...], preferred_element_type=jnp.float32)
    out = out + bproj_ref[...].astype(jnp.float32)
    o_ref[...] = out.astype(o_ref.dtype)


# ---------------------------------------------------------------------------
# pallas_call builders + public wrapper
# ---------------------------------------------------------------------------

_WEIGHT_SINGLE_BUFFER_OK = None   # capability flag resolved on first call


def _weight_spec(shape, single_buffer):
    idx = lambda b, t: (0,) * len(shape)
    if single_buffer:
        # Grid-invariant weights: single-buffer to halve their resident VMEM.
        return pl.BlockSpec(shape, idx, pipeline_mode=pl.Buffered(1))
    return pl.BlockSpec(shape, idx)


def _build_calls(B, N, C, n_pad, q_tile, r_tile, num_heads, head_dim, scale,
                 cdt, bf16_softmax, approx_recip, single_buffer_weights):
    itemsize = jnp.dtype(cdt).itemsize
    wbuf = 1 if single_buffer_weights else 2

    # ---- kernel 1: row-chunked K|V projection --------------------------------
    kv_bytes = (r_tile * C * itemsize * 2            # x row blocks (double-buffered)
                + C * 2 * C * itemsize * wbuf        # Wkv (grid-invariant)
                + r_tile * 2 * C * itemsize * 2      # kv output blocks
                + r_tile * 2 * C * 4)                # f32 matmul result before cast
    kv_call = pl.pallas_call(
        _kv_proj_kernel,
        out_shape=jax.ShapeDtypeStruct((B, n_pad, 2 * C), cdt),
        grid_spec=pltpu.PrefetchScalarGridSpec(
            num_scalar_prefetch=0,
            grid=(B, n_pad // r_tile),
            in_specs=[
                pl.BlockSpec((None, r_tile, C), lambda b, r: (b, r, 0)),
                _weight_spec((C, 2 * C), single_buffer_weights),
            ],
            out_specs=pl.BlockSpec((None, r_tile, 2 * C), lambda b, r: (b, r, 0)),
        ),
        compiler_params=pltpu.CompilerParams(
            dimension_semantics=("parallel", "parallel"),
            vmem_limit_bytes=_vmem_limit(kv_bytes)),
    )

    # ---- kernel 2: fused Q projection + attention + output projection --------
    attn_kernel = functools.partial(
        _attn_kernel, num_heads=num_heads, head_dim=head_dim, scale=scale,
        n_valid=N, bf16_softmax=bool(bf16_softmax),
        approx_recip=bool(approx_recip))
    attn_bytes = (q_tile * C * itemsize * 2              # x q-tile blocks
                  + C * C * itemsize * wbuf              # Wq
                  + n_pad * 2 * C * itemsize * 2         # K|V (full seq per batch)
                  + (C * C + C) * itemsize * wbuf        # Wproj + bias
                  + q_tile * C * itemsize * 2            # output blocks
                  + 2 * q_tile * C * itemsize            # q / att VMEM scratches
                  + 2 * q_tile * n_pad * 4               # per-head s, p (f32 bound)
                  + q_tile * C * 4)                      # f32 projection result
    attn_call = pl.pallas_call(
        attn_kernel,
        out_shape=jax.ShapeDtypeStruct((B, n_pad, C), cdt),
        grid_spec=pltpu.PrefetchScalarGridSpec(
            num_scalar_prefetch=0,
            grid=(B, n_pad // q_tile),
            in_specs=[
                pl.BlockSpec((None, q_tile, C), lambda b, t: (b, t, 0)),     # x tile
                _weight_spec((C, C), single_buffer_weights),                  # Wq
                pl.BlockSpec((None, n_pad, 2 * C), lambda b, t: (b, 0, 0)),   # K|V
                _weight_spec((C, C), single_buffer_weights),                  # Wproj
                _weight_spec((1, C), single_buffer_weights),                  # bias
            ],
            out_specs=pl.BlockSpec((None, q_tile, C), lambda b, t: (b, t, 0)),
            scratch_shapes=[pltpu.VMEM((q_tile, C), cdt),   # staged (scaled) Q
                            pltpu.VMEM((q_tile, C), cdt)],  # per-head outputs
        ),
        compiler_params=pltpu.CompilerParams(
            # No cross-grid-step scratch carry -> both axes parallel, so the
            # q-tile axis feeds the second TensorCore on v7x even at B == 1.
            dimension_semantics=("parallel", "parallel"),
            vmem_limit_bytes=_vmem_limit(attn_bytes)),
    )
    return kv_call, attn_call


def self_attention(x, wqkv, wproj, bproj, *, num_heads: int, q_tile: int = None,
                   max_q_tile: int = None, bf16_softmax: bool = None,
                   approx_reciprocal: bool = None):
    """Forward pass of DINO SelfAttention (rope=None, attn/proj dropout = 0).

    x: (B, N, C); wqkv: (C, 3C) = qkv.weight.T (qkv_bias=False);
    wproj: (C, C) = proj.weight.T; bproj: (1, C) = proj.bias.
    """
    B, N, C = x.shape
    assert C % num_heads == 0
    head_dim = C // num_heads
    scale = float(head_dim) ** -0.5

    cdt = x.dtype
    itemsize = jnp.dtype(cdt).itemsize
    # MXU operands stay in the input dtype (bf16 in production): weights cast
    # to match so the resident VMEM footprint is halved on the bf16 path.
    wqkv = wqkv.astype(cdt)
    wproj = wproj.astype(cdt)
    bproj = bproj.astype(cdt)

    if approx_reciprocal is None:
        approx_reciprocal = itemsize < 4        # EUP approx recip on bf16 path
    if bf16_softmax is None:
        # bf16 exp only where the EUP supports bf16 (v6e/v7x); v5e stays f32.
        bf16_softmax = (itemsize < 4) and not _is_v5e()
    if max_q_tile is None:
        max_q_tile = _default_max_q_tile()
    if q_tile is None:
        q_tile = _pick_q_tile(N, max_q_tile)
    assert q_tile % 8 == 0 or q_tile == N

    n_pad = _round_up(N, q_tile)                # pad seq so tiles stay 8-aligned
    r_tile = _pick_row_tile(n_pad)

    x_in = x if n_pad == N else jnp.pad(x, ((0, 0), (0, n_pad - N), (0, 0)))
    wq, wkv = wqkv[:, :C], wqkv[:, C:]

    def run(single_buffer_weights):
        kv_call, attn_call = _build_calls(
            B, N, C, n_pad, q_tile, r_tile, num_heads, head_dim, scale, cdt,
            bf16_softmax, approx_reciprocal, single_buffer_weights)
        kv = kv_call(x_in, wkv)                         # (B, n_pad, 2C)
        return attn_call(x_in, wq, kv, wproj, bproj)    # (B, n_pad, C)

    global _WEIGHT_SINGLE_BUFFER_OK
    if _WEIGHT_SINGLE_BUFFER_OK is None:
        try:
            out = jax.block_until_ready(run(True))
            _WEIGHT_SINGLE_BUFFER_OK = True
        except Exception:
            # JAX versions without BlockSpec(pipeline_mode=pl.Buffered(1))
            # support: fall back to default buffering (costs VMEM, not
            # correctness).
            _WEIGHT_SINGLE_BUFFER_OK = False
            out = run(False)
    else:
        out = run(_WEIGHT_SINGLE_BUFFER_OK)

    return out if n_pad == N else out[:, :N, :]


# ---------------------------------------------------------------------------
# pure-JAX reference + demo
# ---------------------------------------------------------------------------

def _reference(x, wqkv, wproj, bproj, *, num_heads: int):
    # Mirrors the PyTorch forward (rope=None, dropout=0), f32 math.
    B, N, C = x.shape
    hd = C // num_heads
    scale = hd ** (-0.5)
    qkv = (x @ wqkv).reshape(B, N, 3, num_heads, hd).transpose(2, 0, 3, 1, 4)
    q, k, v = qkv[0], qkv[1], qkv[2]                      # (B, H, N, hd)
    attn = jnp.einsum("bhnd,bhmd->bhnm", q, k) * scale
    attn = jax.nn.softmax(attn, axis=-1)
    out = jnp.einsum("bhnm,bhmd->bhnd", attn, v)
    out = out.transpose(0, 2, 1, 3).reshape(B, N, C)
    return out @ wproj + bproj[0]


if __name__ == "__main__":
    B, N, C = 2, 16, 128
    num_heads = 2                         # head_dim = 64, as in real DINO ViT heads

    key = jax.random.PRNGKey(0)
    kx, kqkv, kproj, kbias = jax.random.split(key, 4)

    x32 = jax.random.normal(kx, (B, N, C), dtype=jnp.float32)
    wqkv32 = jax.random.normal(kqkv, (C, 3 * C), dtype=jnp.float32) * (C ** -0.5)
    wproj32 = jax.random.normal(kproj, (C, C), dtype=jnp.float32) * (C ** -0.5)
    bproj32 = jax.random.normal(kbias, (1, C), dtype=jnp.float32) * 0.01

    # 1) f32 path (exact exp / reciprocal): tight check.
    out32 = jax.block_until_ready(
        self_attention(x32, wqkv32, wproj32, bproj32, num_heads=num_heads))
    ref32 = _reference(x32, wqkv32, wproj32, bproj32, num_heads=num_heads)
    assert out32.shape == (B, N, C)
    np.testing.assert_allclose(np.asarray(out32), np.asarray(ref32),
                               rtol=1e-4, atol=1e-4)

    # 2) padded-sequence path (N=12 -> padded to 16, padded keys masked): tight
    #    f32 check of the masking/padding logic used for e.g. DINO's N=197.
    xp = x32[:, :12, :]
    outp = jax.block_until_ready(
        self_attention(xp, wqkv32, wproj32, bproj32, num_heads=num_heads))
    refp = _reference(xp, wqkv32, wproj32, bproj32, num_heads=num_heads)
    assert outp.shape == (B, 12, C)
    np.testing.assert_allclose(np.asarray(outp), np.asarray(refp),
                               rtol=1e-4, atol=1e-4)

    # 3) bf16 path (production config: bf16 MXU operands, bf16 EUP exp on
    #    v6e/v7x, f32 accumulation/softmax stats, approx reciprocal): loose
    #    sanity check against an f32 reference on the bf16-quantized inputs.
    xb, wqb, wpb, bb = (a.astype(jnp.bfloat16)
                        for a in (x32, wqkv32, wproj32, bproj32))
    outb = jax.block_until_ready(
        self_attention(xb, wqb, wpb, bb, num_heads=num_heads))
    assert outb.dtype == jnp.bfloat16
    refb = _reference(*(a.astype(jnp.float32) for a in (xb, wqb, wpb, bb)),
                      num_heads=num_heads)
    np.testing.assert_allclose(np.asarray(outb.astype(jnp.float32)),
                               np.asarray(refb), rtol=7.5e-2, atol=7.5e-2)

    # TODO(synk): attn_drop / proj_drop in train mode (p > 0) and the optional
    # rope(q, xpos) transform are not implemented; both are identity for the
    # module's defaults / eval mode exercised here.
    print("KERNEL_OK")
</pallas_src>

<mosaic_0001>
module attributes {stable_mosaic.version = 11 : i64} {
  func.func @_kv_proj_kernel(%arg0: i32, %arg1: i32, %arg2: memref<1x16x128xf32, #tpu.memory_space<vmem>>, %arg3: memref<128x256xf32, #tpu.memory_space<vmem>>, %arg4: memref<1x16x256xf32, #tpu.memory_space<vmem>>) attributes {dimension_semantics = [#tpu.dimension_semantics<parallel>, #tpu.dimension_semantics<parallel>], iteration_bounds = array<i64: 2, 1>, scalar_prefetch = 0 : i64, scratch_operands = 0 : i64, tpu.core_type = #tpu.core_type<tc>, window_params = [{transform_indices = @transform_0, window_bounds = array<i64: 1, 16, 128>}, {pipeline_mode = #tpu.pipeline_mode<synchronous>, transform_indices = @transform_1, window_bounds = array<i64: 128, 256>}, {transform_indices = @transform_2, window_bounds = array<i64: 1, 16, 256>}]} {
    %c0 = arith.constant 0 : index
    %c0_0 = arith.constant 0 : index
    %c0_1 = arith.constant 0 : index
    %0 = vector.load %arg2[%c0, %c0_0, %c0_1] : memref<1x16x128xf32, #tpu.memory_space<vmem>>, vector<1x16x128xf32>
    %1 = vector.shape_cast %0 : vector<1x16x128xf32> to vector<16x128xf32>
    %c0_2 = arith.constant 0 : index
    %c0_3 = arith.constant 0 : index
    %2 = vector.load %arg3[%c0_2, %c0_3] : memref<128x256xf32, #tpu.memory_space<vmem>>, vector<128x256xf32>
    %cst = arith.constant dense<0.000000e+00> : vector<16x256xf32>
    %3 = tpu.matmul %1, %2, %cst {dimension_numbers = #tpu.dot_dimension_numbers<[1], [0], [0], [1], [0, 0, 1, 1], [], []>} : vector<16x128xf32>, vector<128x256xf32>, vector<16x256xf32> -> vector<16x256xf32>
    %c0_4 = arith.constant 0 : index
    %c0_5 = arith.constant 0 : index
    %c0_6 = arith.constant 0 : index
    %4 = vector.load %arg4[%c0_4, %c0_5, %c0_6] : memref<1x16x256xf32, #tpu.memory_space<vmem>>, vector<1x16x256xf32>
    %5 = vector.shape_cast %4 : vector<1x16x256xf32> to vector<16x256xf32>
    %6 = vector.shape_cast %3 : vector<16x256xf32> to vector<1x16x256xf32>
    tpu.vector_store %arg4[%c0_4, %c0_5, %c0_6], %6 {strides = array<i32>} : memref<1x16x256xf32, #tpu.memory_space<vmem>>, vector<1x16x256xf32>,
    return
  }
  func.func @transform_0(%arg0: i32, %arg1: i32) -> (i32, i32, i32) {
    %c0_i32 = arith.constant 0 : i32
    %c0_i32_0 = arith.constant 0 : i32
    return %arg0, %arg1, %c0_i32 : i32, i32, i32
  }
  func.func @transform_1(%arg0: i32, %arg1: i32) -> (i32, i32) {
    %c0_i32 = arith.constant 0 : i32
    %c0_i32_0 = arith.constant 0 : i32
    %c0_i32_1 = arith.constant 0 : i32
    return %c0_i32, %c0_i32_0 : i32, i32
  }
  func.func @transform_2(%arg0: i32, %arg1: i32) -> (i32, i32, i32) {
    %c0_i32 = arith.constant 0 : i32
    %c0_i32_0 = arith.constant 0 : i32
    return %arg0, %arg1, %c0_i32 : i32, i32, i32
  }
}

module attributes {stable_mosaic.version = 11 : i64} {
  func.func @_kv_proj_kernel(%arg0: i32, %arg1: i32, %arg2: memref<1x16x128xf32, #tpu.memory_space<vmem>>, %arg3: memref<128x256xf32, #tpu.memory_space<vmem>>, %arg4: memref<1x16x256xf32, #tpu.memory_space<vmem>>) attributes {dimension_semantics = [#tpu.dimension_semantics<parallel>, #tpu.dimension_semantics<parallel>], iteration_bounds = array<i64: 2, 1>, scalar_prefetch = 0 : i64, scratch_operands = 0 : i64, tpu.core_type = #tpu.core_type<tc>, window_params = [{transform_indices = @transform_0, window_bounds = array<i64: 1, 16, 128>}, {pipeline_mode = #tpu.pipeline_mode<synchronous>, transform_indices = @transform_1, window_bounds = array<i64: 128, 256>}, {transform_indices = @transform_2, window_bounds = array<i64: 1, 16, 256>}]} {
    %c0 = arith.constant 0 : index
    %c0_0 = arith.constant 0 : index
    %c0_1 = arith.constant 0 : index
    %0 = vector.load %arg2[%c0, %c0_0, %c0_1] : memref<1x16x128xf32, #tpu.memory_space<vmem>>, vector<1x16x128xf32>
    %1 = vector.shape_cast %0 : vector<1x16x128xf32> to vector<16x128xf32>
    %c0_2 = arith.constant 0 : index
    %c0_3 = arith.constant 0 : index
    %2 = vector.load %arg3[%c0_2, %c0_3] : memref<128x256xf32, #tpu.memory_space<vmem>>, vector<128x256xf32>
    %cst = arith.constant dense<0.000000e+00> : vector<16x256xf32>
    %3 = tpu.matmul %1, %2, %cst {dimension_numbers = #tpu.dot_dimension_numbers<[1], [0], [0], [1], [0, 0, 1, 1], [], []>} : vector<16x128xf32>, vector<128x256xf32>, vector<16x256xf32> -> vector<16x256xf32>
    %c0_4 = arith.constant 0 : index
    %c0_5 = arith.constant 0 : index
    %c0_6 = arith.constant 0 : index
    %4 = vector.load %arg4[%c0_4, %c0_5, %c0_6] : memref<1x16x256xf32, #tpu.memory_space<vmem>>, vector<1x16x256xf32>
    %5 = vector.shape_cast %4 : vector<1x16x256xf32> to vector<16x256xf32>
    %6 = vector.shape_cast %3 : vector<16x256xf32> to vector<1x16x256xf32>
    tpu.vector_store %arg4[%c0_4, %c0_5, %c0_6], %6 {strides = array<i32>} : memref<1x16x256xf32, #tpu.memory_space<vmem>>, vector<1x16x256xf32>,
    return
  }
  func.func @transform_0(%arg0: i32, %arg1: i32) -> (i32, i32, i32) {
    %c0_i32 = arith.constant 0 : i32
    %c0_i32_0 = arith.constant 0 : i32
    return %arg0, %arg1, %c0_i32 : i32, i32, i32
  }
  func.func @transform_1(%arg0: i32, %arg1: i32) -> (i32, i32) {
    %c0_i32 = arith.constant 0 : i32
    %c0_i32_0 = arith.constant 0 : i32
    %c0_i32_1 = arith.constant 0 : i32
    return %c0_i32, %c0_i32_0 : i32, i32
  }
  func.func @transform_2(%arg0: i32, %arg1: i32) -> (i32, i32, i32) {
    %c0_i32 = arith.constant 0 : i32
    %c0_i32_0 = arith.constant 0 : i32
    return %arg0, %arg1, %c0_i32 : i32, i32, i32
  }
}

</mosaic_0001>

<bundles_post_ra>
// kernel: tpu_custom_call.1
= control target key start
LH: loop header
LB: loop body
LE: loop exit
PB: predicated region body
PF: predicated region fallthrough
CT: control target
= control target key end

     0   :  { %7 = vsyncpa [#allocation3], 0  ;;  %s968_s0 = inlined_call_operand.hbm [shape: f32[2,16,128], index: 0, kind: input, shape index: {}]   ;;  %s969_s1 = inlined_call_operand.hbm [shape: f32[128,256], index: 1, kind: input, shape index: {}]   ;;  %s970_s2 = inlined_call_operand.hbm [shape: f32[2,16,256], index: 2, kind: output, shape index: {}]  }
   0x1   :  { %9 = vsyncpa [#allocation3 + $0x1], 0 }
   0x2   :  { %10 = vsyncpa [#allocation6], 0 }
   0x3   :  { %11 = vsyncpa [#allocation4], 0 }
   0x4   :  { %13 = vsyncpa [#allocation4 + $0x1], 0  ;;  %s744_s9 = smov 0   ;;  %s746_s10 = smov 0  }
   0x5   :  { %s748_s11 = smov 0   ;;  %s750_s12 = smov 0  }
   0x6   :  { %s752_s13 = smov 0   ;;  %s754_s14 = smov 0  }
   0x7 LB: > { %s426_s15 = sadd.s32 4294967295, %s717_s14   ;;  %s427_s16 = sadd.s32 4294967294, %s717_s14   ;;  %s717_s14 = sphi %s754_s14, %s19_s14   ;;  %s713_s13 = sphi %s752_s13, %s994_s13   ;;  %s709_s12 = sphi %s750_s12, %s993_s12   ;;  %s705_s11 = sphi %s748_s11, %s992_s11   ;;  %s701_s10 = sphi %s746_s10, %s991_s10   ;;  %s697_s9 = sphi %s744_s9, %s990_s9  }
   0x8   : > { %p53_p0 = scmp.ne.s32.totalorder %s701_s10, %s697_s9  ;;  %p778_p1 = scmp.eq.s32.totalorder %s426_s15, 0 }
   0x9   : > { %p782_p2 = scmp.eq.s32.totalorder %s426_s15, 1  ;;  %p106_p3 = scmp.eq.s32.totalorder %s427_s16, 1 }
   0xa   : > { %s975_s17 = scalar_select %p778_p1, 1, 0 }
   0xb   : > { %s976_s18 = scalar_select %p782_p2, 1, 0 }
   0xc   : > { %p788_p4 = por %p778_p1, %p53_p0  ;;  %p428_p5 = scmp.ge.s32.totalorder %s717_s14, 1 }
   0xd   : > { %p793_p6 = por %p106_p3, %p53_p0  ;;  %p113_p7 = scmp.lt.s32.totalorder %s717_s14, 3 }
   0xe   : > { %s977_s19 = scalar_select %p788_p4, 1, 0 }
   0xf   : > { %s978_s20 = scalar_select %p793_p6, 1, 0 }
  0x10   : > { %p798_p8 = pnand %p428_p5, %p113_p7  ;;  %s719_s22 = smov [#allocation5]  }
  0x11   : > { %s125_s23 = sshll.u32 %s719_s22, 4  ;;  %s31_s25 = sadd.s32 1, %s713_s13  ;;  %s126_s23 = int_to_ptr.vmem [resolvable:$true] %s125_s23 }
  0x12   : > { %s979_s21 = scalar_select %p798_p8, 1, 0 }
  0x13   : > { %p501_p9 = pneg %p798_p8  ;;  %s573_s28 = scalar_lea.hbm %s969_s1, 4096 }
  0x14   : > { %p574_p12 = scmp.ne.s32.totalorder %s969_s1, %s573_s28  ;;  %p580_p5 = scmp.lt.u32.totalorder %s573_s28, %s969_s1 }
  0x15   : > { %p807_p11 = pnand %p501_p9, %p778_p1 }
  0x17   : > { %p575_p13 = pneg %p807_p11 }
  0x19   : > { %p576_p0 = pnand %p575_p13, %p574_p12 }
  0x1b   : > { %p577_p3 = pneg %p576_p0 }
  0x1d   : > { %p582_p7 = pnand %p580_p5, %p577_p3 }
  0x1f   : > { %585 = shalt.err (!%p582_p7)
}
  0x20   : > { %s586_s5 = scalar_lea.vmem %s126_s23, 4096  ;;  %p594_p1 = scmp.lt.s32.totalorder %s126_s23, %s126_s23 }
  0x21   : > { %p587_p9 = scmp.ne.s32.totalorder %s126_s23, %s586_s5  ;;  %p595_p4 = scmp.lt.s32.totalorder %s586_s5, %s586_s5 }
  0x23   : > { %p589_p10 = pnand %p587_p9, %p575_p13  ;;  %p596_p8 = por %p595_p4, %p594_p1 }
  0x25   : > { %p590_p6 = pneg %p589_p10 }
  0x27   : > { %p597_p2 = pnand %p596_p8, %p590_p6 }
  0x29   : > { %600 = shalt.err (!%p597_p2)
}
  0x2a   : > { %s720_s6 = smov 256   ;;  %s721_s7 = smov 16  }
  0x2b   : > { %504 = dma.hbm_to_vmem [thread:$0]  (!%p807_p11), %s969_s1, 4096, %s126_s23, [#allocation6], %s720_s6, %s720_s6, %s721_s7  }
  0x2c   : > { %p33_p1 = scmp.ge.s32.totalorder %s31_s25, 2  ;;  %s40_s16 = sadd.s32 1, %s705_s11 }
  0x2d   : > { %p47_p2 = scmp.ne.s32.totalorder %s705_s11, %s701_s10  ;;  %p48_p4 = scmp.eq.s32.totalorder %s717_s14, 0 }
  0x2e   : > { %s996_s25 = smov (%p33_p1, %s31_s25), 0  ;;  %p982_p8 = scmp.ne.s32.totalorder %s976_s18, 0 }
  0x2f   : > { %p834_p6 = por %p48_p4, %p47_p2  ;;  %s35_s24 = ssub.s32 %s713_s13, %s996_s25 }
  0x30   : > { %p840_p10 = por %p982_p8, %p47_p2  ;;  %p514_p12 = scmp.lt.s32.totalorder %s717_s14, 2 }
  0x31   : > { %p38_p11 = scmp.eq.s32.totalorder %s35_s24, 0  ;;  %s139_s23 = sand.u32 1, %s705_s11  }
  0x32   : > { %s431_s27 = sshll.u32 %s139_s23, 4  ;;  %s443_s29 = sshll.u32 %s713_s13, 8 }
  0x33   : > { %s849_s28 = scalar_select %p38_p11, %s705_s11, %s40_s16  }
  0x34   : > { %s855_s4 = scalar_lea.hbm %s968_s0, %s443_s29  ;;  %s143_s18 = scalar_lea.vmem [#allocation2], %s431_s27 }
  0x35   : > { %s152_s5 = sshll.u32 %s143_s18, 4  ;;  %p861_p13 = pnand %p514_p12, %p834_p6  ;;  %s857_s5 = int_to_ptr.vmem [resolvable:$true] %s152_s5 }
  0x36   : > { %s865_s7 = scalar_lea.sflag [#allocation3], %s139_s23  ;;  %s601_s8 = scalar_lea.hbm %s855_s4, 256 }
  0x37   : > { %p602_p0 = scmp.ne.s32.totalorder %s855_s4, %s601_s8  ;;  %p603_p3 = pneg %p861_p13 }
  0x38   : > { %s606_s22 = scalar_lea.hbm %s968_s0, 512  ;;  %p607_p9 = scmp.lt.u32.totalorder %s855_s4, %s968_s0 }
  0x39   : > { %p604_p5 = pnand %p603_p3, %p602_p0  ;;  %p608_p1 = scmp.lt.u32.totalorder %s606_s22, %s601_s8 }
  0x3a   : > { %p610_p4 = scmp.lt.u32.totalorder %s601_s8, %s855_s4 }
  0x3b   : > { %p605_p7 = pneg %p604_p5  ;;  %p609_p2 = por %p608_p1, %p607_p9 }
  0x3d   : > { %p611_p6 = por %p610_p4, %p609_p2 }
  0x3f   : > { %p612_p8 = pnand %p611_p6, %p605_p7 }
  0x41   : > { %615 = shalt.err (!%p612_p8)
}
  0x42   : > { %s616_s23 = scalar_lea.vmem %s857_s5, 256  ;;  %s722_s29 = smov [#allocation2]  }
  0x43   : > { %p617_p12 = scmp.ne.s32.totalorder %s857_s5, %s616_s23  ;;  %s621_s30 = sshll.u32 %s722_s29, 4  ;;  %s622_s30 = int_to_ptr.vmem [resolvable:$false] %s621_s30 }
  0x44   : > { %s623_s3 = scalar_lea.vmem %s622_s30, 512  ;;  %p624_p5 = scmp.lt.s32.totalorder %s857_s5, %s622_s30 }
  0x45   : > { %p619_p11 = pnand %p617_p12, %p603_p3  ;;  %p625_p9 = scmp.lt.s32.totalorder %s623_s3, %s616_s23 }
  0x47   : > { %p620_p0 = pneg %p619_p11  ;;  %p626_p1 = por %p625_p9, %p624_p5 }
  0x49   : > { %p627_p2 = pnand %p626_p1, %p620_p0 }
  0x4b   : > { %630 = shalt.err (!%p627_p2)
}
  0x4c   : > { %s723_s18 = smov 128   ;;  %s724_s8 = smov 8  }
  0x4d   : > { %508 = dma.hbm_to_vmem [thread:$0]  (!%p861_p13), %s855_s4, 256, %s857_s5, %s865_s7, %s723_s18, %s723_s18, %s724_s8  }
  0x4e   : > { %p985_p3 = scmp.ne.s32.totalorder %s979_s21, 0 }
  0x4f   : > { %s896_s15 = sand.u32 (!%p985_p3), 1, %s701_s10   ;;  %p986_p7 = scmp.ne.s32.totalorder (!%p985_p3), %s977_s19, 0 }
  0x50   : > { %164 = sbr.rel (%p985_p3) target bundleno = 354 (0x162), region = 28  ;;  %s435_s16 = sshll.u32 (!%p985_p3), %s896_s15, 4 }
  0x51   : > { %s167_s22 = scalar_lea.sflag (!%p985_p3), [#allocation3], %s896_s15  ;;  %s900_s24 = scalar_lea.vmem (!%p985_p3), [#allocation2], %s435_s16 }
  0x57   : > { %684 = dma.done.wait (%p986_p7), %s167_s22, 256  }
  0x58   : > { %686 = vsyncadd (%p986_p7), %s167_s22, 4294967040  ;;  %p987_p13 = scmp.ne.s32.totalorder %s975_s17, 0 }
  0x5a   : > { %688 = dma.done.wait (%p987_p13), [#allocation6], 4096  }
  0x5b   : > { %690 = vsyncadd (%p987_p13), [#allocation6], 4294963200  ;;  %v725_v0 = vmov 0.0   ;;  %v200_v1 = vld [vmem:[#allocation5 + $0x8] sm:$0xff]  ;;  %v202_v2 = vld [vmem:[#allocation5 + $0x18] sm:$0xff]  ;;  %s437_s17 = sshll.u32 %s896_s15, 5 }
  0x5c   : > { %295 = vmatprep.mubr.f32.mxu0 %v725_v0  ;;  %301 = vmatprep.mubr.f32.mxu1 %v725_v0  ;;  %v199_v3 = vld [vmem:[#allocation5] sm:$0xff]  ;;  %v445_v4 = vpack.c.bf16 %v202_v2, %v200_v1  ;;  %v201_v5 = vld [vmem:[#allocation5 + $0x10] sm:$0xff]  ;;  %v204_v6 = vld [vmem:[#allocation5 + $0x28] sm:$0xff]  ;;  %s194_s19 = scalar_lea.vmem [#allocation7], %s437_s17  ;;  %s444_s4 = sshll.u32 %s709_s12, 9 }
  0x5d   : > { %v206_v7 = vld [vmem:[#allocation5 + $0x38] sm:$0xff]  ;;  %v447_v8 = vpack.c.bf16 %v201_v5, %v199_v3  ;;  %v203_v10 = vld [vmem:[#allocation5 + $0x20] sm:$0xff]  ;;  %v205_v11 = vld [vmem:[#allocation5 + $0x30] sm:$0xff]  ;;  %s329_s21 = sshll.u32 %s194_s19, 4  ;;  %s919_s7 = scalar_lea.hbm %s970_s2, %s444_s4  ;;  %s914_s21 = int_to_ptr.vmem [resolvable:$true] %s329_s21 }
  0x5e   : > { %v449_v9 = vpack.c.bf16 %v206_v7, %v204_v6  ;;  %v208_v12 = vld [vmem:[#allocation5 + $0x48] sm:$0xff]  ;;  %446 = vmatprep.subr.bf16.mxu0 %v445_v4  ;;  %477 = vmatprep.subr.bf16.mxu1 %v445_v4  ;;  %v210_v13 = vld [vmem:[#allocation5 + $0x58] sm:$0xff]  ;;  %v451_v14 = vpack.c.bf16 %v205_v11, %v203_v10  ;;  %v207_v16 = vld [vmem:[#allocation5 + $0x40] sm:$0xff]  ;;  %s313_s27 = scalar_lea.sflag [#allocation4], %s896_s15  ;;  %s631_s12 = scalar_lea.vmem %s914_s21, 512 }
  0x5f   : > { %448 = vmatpush1.bf16.msra.mxu0 %v447_v8  ;;  %485 = vmatpush1.bf16.msra.mxu1 %v447_v8  ;;  %v453_v15 = vpack.c.bf16 %v210_v13, %v208_v12  ;;  %v209_v17 = vld [vmem:[#allocation5 + $0x50] sm:$0xff]  ;;  %v212_v18 = vld [vmem:[#allocation5 + $0x68] sm:$0xff]  ;;  %v214_v19 = vld [vmem:[#allocation5 + $0x78] sm:$0xff]  ;;  %p632_p4 = scmp.ne.s32.totalorder %s914_s21, %s631_s12  ;;  %s726_s23 = smov [#allocation7]  }
  0x60   : > { %450 = vmatprep.subr.bf16.mxu0 %v449_v9  ;;  %478 = vmatprep.subr.bf16.mxu1 %v449_v9  ;;  %v455_v20 = vpack.c.bf16 %v209_v17, %v207_v16  ;;  %v457_v21 = vpack.c.bf16 %v214_v19, %v212_v18  ;;  %v211_v22 = vld [vmem:[#allocation5 + $0x60] sm:$0xff]  ;;  %v213_v23 = vld [vmem:[#allocation5 + $0x70] sm:$0xff]  ;;  %v216_v24 = vld [vmem:[#allocation5 + $0x88] sm:$0xff]  ;;  %s635_s29 = sshll.u32 %s726_s23, 4  ;;  %s636_s29 = int_to_ptr.vmem [resolvable:$false] %s635_s29 }
  0x61   : > { %v218_v25 = vld [vmem:[#allocation5 + $0x98] sm:$0xff]  ;;  %v459_v26 = vpack.c.bf16 %v213_v23, %v211_v22  ;;  %v215_v28 = vld [vmem:[#allocation5 + $0x80] sm:$0xff]  ;;  %v217_v29 = vld [vmem:[#allocation5 + $0x90] sm:$0xff]  ;;  %p633_p6 = pnand %p632_p4, %p840_p10  ;;  %s637_s30 = scalar_lea.vmem %s636_s29, 1024 }
  0x62   : > { %v461_v27 = vpack.c.bf16 %v218_v25, %v216_v24  ;;  %v220_v30 = vld [vmem:[#allocation5 + $0xa8] sm:$0xff]  ;;  %v222_v31 = vld [vmem:[#allocation5 + $0xb8] sm:$0xff]  ;;  %v463_v32 = vpack.c.bf16 %v217_v29, %v215_v28  ;;  %v219_v34 = vld [vmem:[#allocation5 + $0xa0] sm:$0xff]  ;;  %p638_p12 = scmp.lt.s32.totalorder %s914_s21, %s636_s29  ;;  %p639_p11 = scmp.lt.s32.totalorder %s637_s30, %s631_s12 }
  0x63   : > { %452 = vmatpush1.bf16.msra.mxu0 %v451_v14  ;;  %486 = vmatpush1.bf16.msra.mxu1 %v451_v14  ;;  %v465_v33 = vpack.c.bf16 %v222_v31, %v220_v30  ;;  %v221_v35 = vld [vmem:[#allocation5 + $0xb0] sm:$0xff]  ;;  %v224_v36 = vld [vmem:[#allocation5 + $0xc8] sm:$0xff]  ;;  %v226_v37 = vld [vmem:[#allocation5 + $0xd8] sm:$0xff]  ;;  %p634_p8 = pneg %p633_p6 }
  0x64   : > { %454 = vmatprep.subr.bf16.mxu0 %v453_v15  ;;  %479 = vmatprep.subr.bf16.mxu1 %v453_v15  ;;  %v467_v38 = vpack.c.bf16 %v221_v35, %v219_v34  ;;  %v469_v39 = vpack.c.bf16 %v226_v37, %v224_v36  ;;  %v223_v40 = vld [vmem:[#allocation5 + $0xc0] sm:$0xff]  ;;  %v225_v41 = vld [vmem:[#allocation5 + $0xd0] sm:$0xff]  ;;  %v228_v42 = vld [vmem:[#allocation5 + $0xe8] sm:$0xff]  ;;  %p640_p0 = por %p639_p11, %p638_p12 }
  0x65   : > { %v230_v43 = vld [vmem:[#allocation5 + $0xf8] sm:$0xff]  ;;  %v471_v44 = vpack.c.bf16 %v225_v41, %v223_v40  ;;  %v227_v46 = vld [vmem:[#allocation5 + $0xe0] sm:$0xff]  ;;  %v229_v47 = vld [vmem:[#allocation5 + $0xf0] sm:$0xff] }
  0x66   : > { %v473_v45 = vpack.c.bf16 %v230_v43, %v228_v42  ;;  %v475_v48 = vpack.c.bf16 %v229_v47, %v227_v46  ;;  %v197_v49 = vld [vmem:[%s900_s24] sm:$0xff]  ;;  %v198_v50 = vld [vmem:[%s900_s24 + $0x8] sm:$0xff]  ;;  %p641_p5 = pnand %p640_p0, %p634_p8 }
  0x67   : > { %456 = vmatpush1.bf16.msra.mxu0 %v455_v20  ;;  %487 = vmatpush1.bf16.msra.mxu1 %v455_v20 }
  0x68   : > { %458 = vmatprep.subr.bf16.mxu0 %v457_v21  ;;  %480 = vmatprep.subr.bf16.mxu1 %v457_v21 }
  0x6b   : > { %460 = vmatpush1.bf16.msra.mxu0 %v459_v26  ;;  %488 = vmatpush1.bf16.msra.mxu1 %v459_v26 }
  0x6c   : > { %462 = vmatprep.subr.bf16.mxu0 %v461_v27  ;;  %481 = vmatprep.subr.bf16.mxu1 %v461_v27 }
  0x6f   : > { %464 = vmatpush1.bf16.msra.mxu0 %v463_v32  ;;  %489 = vmatpush1.bf16.msra.mxu1 %v463_v32 }
  0x70   : > { %466 = vmatprep.subr.bf16.mxu0 %v465_v33  ;;  %482 = vmatprep.subr.bf16.mxu1 %v465_v33 }
  0x73   : > { %468 = vmatpush1.bf16.msra.mxu0 %v467_v38  ;;  %490 = vmatpush1.bf16.msra.mxu1 %v467_v38 }
  0x74   : > { %470 = vmatprep.subr.bf16.mxu0 %v469_v39  ;;  %483 = vmatprep.subr.bf16.mxu1 %v469_v39 }
  0x77   : > { %472 = vmatpush1.bf16.msra.mxu0 %v471_v44  ;;  %491 = vmatpush1.bf16.msra.mxu1 %v471_v44 }
  0x78   : > { %474 = vmatprep.subr.bf16.mxu0 %v473_v45  ;;  %484 = vmatprep.subr.bf16.mxu1 %v473_v45 }
  0x7b   : > { %476 = vmatpush1.bf16.msra.mxu0 %v475_v48  ;;  %492 = vmatpush1.bf16.msra.mxu1 %v475_v48 }
  0x7e   : > { %296 = vmatmul.mubr.f32.vlgmr.msra.gmra.mrb[0].mxu0 %v197_v49  ;;  %302 = vmatmul.mubr.f32.vlgmr.msra.gmra.mrb[0].mxu1 %v198_v50 }
 0x151   : > { %v297_v51 = vpop.f32.mrb[0].mxu0  ;;  %v303_v52 = vpop.f32.mrb[0].mxu1 }
 0x152   : > { %308 = vst [vmem:[%s194_s19] sm:$0xff] %v297_v51  ;;  %310 = vst [vmem:[%s194_s19 + $0x10] sm:$0xff] %v303_v52  ;;  %v299_v53 = vpop.f32.mrb[1].mxu0  ;;  %v305_v54 = vpop.f32.mrb[1].mxu1 }
 0x153   : > { %309 = vst [vmem:[%s194_s19 + $0x8] sm:$0xff] %v299_v53  ;;  %311 = vst [vmem:[%s194_s19 + $0x18] sm:$0xff] %v305_v54 }
 0x154   : > { %644 = shalt.err (!%p641_p5)
}
 0x155   : > { %s645_s3 = scalar_lea.hbm %s919_s7, 512  ;;  %s649_s16 = scalar_lea.hbm %s970_s2, 1024 }
 0x156   : > { %p646_p9 = scmp.ne.s32.totalorder %s919_s7, %s645_s3  ;;  %p650_p3 = scmp.lt.u32.totalorder %s919_s7, %s970_s2 }
 0x157   : > { %p651_p7 = scmp.lt.u32.totalorder %s649_s16, %s645_s3  ;;  %p653_p4 = scmp.lt.u32.totalorder %s645_s3, %s919_s7 }
 0x158   : > { %p647_p1 = pnand %p646_p9, %p840_p10 }
 0x159   : > { %p652_p13 = por %p651_p7, %p650_p3 }
 0x15a   : > { %p648_p2 = pneg %p647_p1 }
 0x15b   : > { %p654_p6 = por %p653_p4, %p652_p13 }
 0x15d   : > { %p655_p8 = pnand %p654_p6, %p648_p2 }
 0x15f   : > { %658 = shalt.err (!%p655_p8)
}
 0x160   : > { %s727_s17 = smov 256   ;;  %s728_s19 = smov 16  }
 0x161   : > { %499 = dma.vmem_to_hbm [thread:$0]  (%p840_p10), %s914_s21, 512, %s919_s7, %s313_s27, %s727_s17, %s727_s17, %s728_s19  }
 0x162 PF: > { %s344_s4 = sand.u32 1, %s697_s9   ;;  %p988_p12 = scmp.ne.s32.totalorder %s978_s20, 0 }
 0x163   : > { %p989_p11 = scmp.ge.s32.totalorder %s717_s14, 2  ;;  %s345_s5 = scalar_lea.sflag [#allocation4], %s344_s4 }
 0x165   : > { %p510_p0 = pnand %p989_p11, %p988_p12 }
 0x167   : > { %692 = dma.done.wait (!%p510_p0), %s345_s5, 512  }
 0x168   : > { %694 = vsyncadd (!%p510_p0), %s345_s5, 4294966784  ;;  %s19_s14 = sadd.s32 1, %s717_s14   ;;  %s990_s9 = smov %s701_s10 }
 0x169   : > { %p16_p5 = scmp.ge.s32.totalorder %s19_s14, 4   ;;  %s991_s10 = smov %s705_s11 }
 0x16a   : > { %s992_s11 = smov %s849_s28  ;;  %s993_s12 = smov %s713_s13 }
 0x16b   : > { %s994_s13 = smov %s996_s25  ;;  %18 = sbr.rel (!%p16_p5) target bundleno = 7 (0x7), region = 77 }
 0x172   :  { %350 = vsyncpa [#allocation3], 1 }
 0x173   :  { %352 = vsyncpa [#allocation3 + $0x1], 1 }
 0x174   :  { %353 = vsyncpa [#allocation6], 1 }
 0x175   :  { %354 = vsyncpa [#allocation4], 1 }
 0x176   :  { %356 = vsyncpa [#allocation4 + $0x1], 1 }

// kernel: tpu_custom_call.1
= control target key start
LH: loop header
LB: loop body
LE: loop exit
PB: predicated region body
PF: predicated region fallthrough
CT: control target
= control target key end

     0   :  { %7 = vsyncpa [#allocation3], 0  ;;  %s968_s0 = inlined_call_operand.hbm [shape: f32[2,16,128], index: 0, kind: input, shape index: {}]   ;;  %s969_s1 = inlined_call_operand.hbm [shape: f32[128,256], index: 1, kind: input, shape index: {}]   ;;  %s970_s2 = inlined_call_operand.hbm [shape: f32[2,16,256], index: 2, kind: output, shape index: {}]  }
   0x1   :  { %9 = vsyncpa [#allocation3 + $0x1], 0 }
   0x2   :  { %10 = vsyncpa [#allocation6], 0 }
   0x3   :  { %11 = vsyncpa [#allocation4], 0 }
   0x4   :  { %13 = vsyncpa [#allocation4 + $0x1], 0  ;;  %s744_s9 = smov 0   ;;  %s746_s10 = smov 0  }
   0x5   :  { %s748_s11 = smov 0   ;;  %s750_s12 = smov 0  }
   0x6   :  { %s752_s13 = smov 0   ;;  %s754_s14 = smov 0  }
   0x7 LB: > { %s426_s15 = sadd.s32 4294967295, %s717_s14   ;;  %s427_s16 = sadd.s32 4294967294, %s717_s14   ;;  %s717_s14 = sphi %s754_s14, %s19_s14   ;;  %s713_s13 = sphi %s752_s13, %s994_s13   ;;  %s709_s12 = sphi %s750_s12, %s993_s12   ;;  %s705_s11 = sphi %s748_s11, %s992_s11   ;;  %s701_s10 = sphi %s746_s10, %s991_s10   ;;  %s697_s9 = sphi %s744_s9, %s990_s9  }
   0x8   : > { %p53_p0 = scmp.ne.s32.totalorder %s701_s10, %s697_s9  ;;  %p778_p1 = scmp.eq.s32.totalorder %s426_s15, 0 }
   0x9   : > { %p782_p2 = scmp.eq.s32.totalorder %s426_s15, 1  ;;  %p106_p3 = scmp.eq.s32.totalorder %s427_s16, 1 }
   0xa   : > { %s975_s17 = scalar_select %p778_p1, 1, 0 }
   0xb   : > { %s976_s18 = scalar_select %p782_p2, 1, 0 }
   0xc   : > { %p788_p4 = por %p778_p1, %p53_p0  ;;  %p428_p5 = scmp.ge.s32.totalorder %s717_s14, 1 }
   0xd   : > { %p793_p6 = por %p106_p3, %p53_p0  ;;  %p113_p7 = scmp.lt.s32.totalorder %s717_s14, 3 }
   0xe   : > { %s977_s19 = scalar_select %p788_p4, 1, 0 }
   0xf   : > { %s978_s20 = scalar_select %p793_p6, 1, 0 }
  0x10   : > { %p798_p8 = pnand %p428_p5, %p113_p7  ;;  %s719_s22 = smov [#allocation5]  }
  0x11   : > { %s125_s23 = sshll.u32 %s719_s22, 4  ;;  %s31_s25 = sadd.s32 1, %s713_s13  ;;  %s126_s23 = int_to_ptr.vmem [resolvable:$true] %s125_s23 }
  0x12   : > { %s979_s21 = scalar_select %p798_p8, 1, 0 }
  0x13   : > { %p501_p9 = pneg %p798_p8  ;;  %s573_s28 = scalar_lea.hbm %s969_s1, 4096 }
  0x14   : > { %p574_p12 = scmp.ne.s32.totalorder %s969_s1, %s573_s28  ;;  %p580_p5 = scmp.lt.u32.totalorder %s573_s28, %s969_s1 }
  0x15   : > { %p807_p11 = pnand %p501_p9, %p778_p1 }
  0x17   : > { %p575_p13 = pneg %p807_p11 }
  0x19   : > { %p576_p0 = pnand %p575_p13, %p574_p12 }
  0x1b   : > { %p577_p3 = pneg %p576_p0 }
  0x1d   : > { %p582_p7 = pnand %p580_p5, %p577_p3 }
  0x1f   : > { %585 = shalt.err (!%p582_p7)
}
  0x20   : > { %s586_s5 = scalar_lea.vmem %s126_s23, 4096  ;;  %p594_p1 = scmp.lt.s32.totalorder %s126_s23, %s126_s23 }
  0x21   : > { %p587_p9 = scmp.ne.s32.totalorder %s126_s23, %s586_s5  ;;  %p595_p4 = scmp.lt.s32.totalorder %s586_s5, %s586_s5 }
  0x23   : > { %p589_p10 = pnand %p587_p9, %p575_p13  ;;  %p596_p8 = por %p595_p4, %p594_p1 }
  0x25   : > { %p590_p6 = pneg %p589_p10 }
  0x27   : > { %p597_p2 = pnand %p596_p8, %p590_p6 }
  0x29   : > { %600 = shalt.err (!%p597_p2)
}
  0x2a   : > { %s720_s6 = smov 256   ;;  %s721_s7 = smov 16  }
  0x2b   : > { %504 = dma.hbm_to_vmem [thread:$0]  (!%p807_p11), %s969_s1, 4096, %s126_s23, [#allocation6], %s720_s6, %s720_s6, %s721_s7  }
  0x2c   : > { %p33_p1 = scmp.ge.s32.totalorder %s31_s25, 2  ;;  %s40_s16 = sadd.s32 1, %s705_s11 }
  0x2d   : > { %p47_p2 = scmp.ne.s32.totalorder %s705_s11, %s701_s10  ;;  %p48_p4 = scmp.eq.s32.totalorder %s717_s14, 0 }
  0x2e   : > { %s996_s25 = smov (%p33_p1, %s31_s25), 0  ;;  %p982_p8 = scmp.ne.s32.totalorder %s976_s18, 0 }
  0x2f   : > { %p834_p6 = por %p48_p4, %p47_p2  ;;  %s35_s24 = ssub.s32 %s713_s13, %s996_s25 }
  0x30   : > { %p840_p10 = por %p982_p8, %p47_p2  ;;  %p514_p12 = scmp.lt.s32.totalorder %s717_s14, 2 }
  0x31   : > { %p38_p11 = scmp.eq.s32.totalorder %s35_s24, 0  ;;  %s139_s23 = sand.u32 1, %s705_s11  }
  0x32   : > { %s431_s27 = sshll.u32 %s139_s23, 4  ;;  %s443_s29 = sshll.u32 %s713_s13, 8 }
  0x33   : > { %s849_s28 = scalar_select %p38_p11, %s705_s11, %s40_s16  }
  0x34   : > { %s855_s4 = scalar_lea.hbm %s968_s0, %s443_s29  ;;  %s143_s18 = scalar_lea.vmem [#allocation2], %s431_s27 }
  0x35   : > { %s152_s5 = sshll.u32 %s143_s18, 4  ;;  %p861_p13 = pnand %p514_p12, %p834_p6  ;;  %s857_s5 = int_to_ptr.vmem [resolvable:$true] %s152_s5 }
  0x36   : > { %s865_s7 = scalar_lea.sflag [#allocation3], %s139_s23  ;;  %s601_s8 = scalar_lea.hbm %s855_s4, 256 }
  0x37   : > { %p602_p0 = scmp.ne.s32.totalorder %s855_s4, %s601_s8  ;;  %p603_p3 = pneg %p861_p13 }
  0x38   : > { %s606_s22 = scalar_lea.hbm %s968_s0, 512  ;;  %p607_p9 = scmp.lt.u32.totalorder %s855_s4, %s968_s0 }
  0x39   : > { %p604_p5 = pnand %p603_p3, %p602_p0  ;;  %p608_p1 = scmp.lt.u32.totalorder %s606_s22, %s601_s8 }
  0x3a   : > { %p610_p4 = scmp.lt.u32.totalorder %s601_s8, %s855_s4 }
  0x3b   : > { %p605_p7 = pneg %p604_p5  ;;  %p609_p2 = por %p608_p1, %p607_p9 }
  0x3d   : > { %p611_p6 = por %p610_p4, %p609_p2 }
  0x3f   : > { %p612_p8 = pnand %p611_p6, %p605_p7 }
  0x41   : > { %615 = shalt.err (!%p612_p8)
}
  0x42   : > { %s616_s23 = scalar_lea.vmem %s857_s5, 256  ;;  %s722_s29 = smov [#allocation2]  }
  0x43   : > { %p617_p12 = scmp.ne.s32.totalorder %s857_s5, %s616_s23  ;;  %s621_s30 = sshll.u32 %s722_s29, 4  ;;  %s622_s30 = int_to_ptr.vmem [resolvable:$false] %s621_s30 }
  0x44   : > { %s623_s3 = scalar_lea.vmem %s622_s30, 512  ;;  %p624_p5 = scmp.lt.s32.totalorder %s857_s5, %s622_s30 }
  0x45   : > { %p619_p11 = pnand %p617_p12, %p603_p3  ;;  %p625_p9 = scmp.lt.s32.totalorder %s623_s3, %s616_s23 }
  0x47   : > { %p620_p0 = pneg %p619_p11  ;;  %p626_p1 = por %p625_p9, %p624_p5 }
  0x49   : > { %p627_p2 = pnand %p626_p1, %p620_p0 }
  0x4b   : > { %630 = shalt.err (!%p627_p2)
}
  0x4c   : > { %s723_s18 = smov 128   ;;  %s724_s8 = smov 8  }
  0x4d   : > { %508 = dma.hbm_to_vmem [thread:$0]  (!%p861_p13), %s855_s4, 256, %s857_s5, %s865_s7, %s723_s18, %s723_s18, %s724_s8  }
  0x4e   : > { %p985_p3 = scmp.ne.s32.totalorder %s979_s21, 0 }
  0x4f   : > { %s896_s15 = sand.u32 (!%p985_p3), 1, %s701_s10   ;;  %p986_p7 = scmp.ne.s32.totalorder (!%p985_p3), %s977_s19, 0 }
  0x50   : > { %164 = sbr.rel (%p985_p3) target bundleno = 354 (0x162), region = 28  ;;  %s435_s16 = sshll.u32 (!%p985_p3), %s896_s15, 4 }
  0x51   : > { %s167_s22 = scalar_lea.sflag (!%p985_p3), [#allocation3], %s896_s15  ;;  %s900_s24 = scalar_lea.vmem (!%p985_p3), [#allocation2], %s435_s16 }
  0x57   : > { %684 = dma.done.wait (%p986_p7), %s167_s22, 256  }
  0x58   : > { %686 = vsyncadd (%p986_p7), %s167_s22, 4294967040  ;;  %p987_p13 = scmp.ne.s32.totalorder %s975_s17, 0 }
  0x5a   : > { %688 = dma.done.wait (%p987_p13), [#allocation6], 4096  }
  0x5b   : > { %690 = vsyncadd (%p987_p13), [#allocation6], 4294963200  ;;  %v725_v0 = vmov 0.0   ;;  %v200_v1 = vld [vmem:[#allocation5 + $0x8] sm:$0xff]  ;;  %v202_v2 = vld [vmem:[#allocation5 + $0x18] sm:$0xff]  ;;  %s437_s17 = sshll.u32 %s896_s15, 5 }
  0x5c   : > { %295 = vmatprep.mubr.f32.mxu0 %v725_v0  ;;  %301 = vmatprep.mubr.f32.mxu1 %v725_v0  ;;  %v199_v3 = vld [vmem:[#allocation5] sm:$0xff]  ;;  %v445_v4 = vpack.c.bf16 %v202_v2, %v200_v1  ;;  %v201_v5 = vld [vmem:[#allocation5 + $0x10] sm:$0xff]  ;;  %v204_v6 = vld [vmem:[#allocation5 + $0x28] sm:$0xff]  ;;  %s194_s19 = scalar_lea.vmem [#allocation7], %s437_s17  ;;  %s444_s4 = sshll.u32 %s709_s12, 9 }
  0x5d   : > { %v206_v7 = vld [vmem:[#allocation5 + $0x38] sm:$0xff]  ;;  %v447_v8 = vpack.c.bf16 %v201_v5, %v199_v3  ;;  %v203_v10 = vld [vmem:[#allocation5 + $0x20] sm:$0xff]  ;;  %v205_v11 = vld [vmem:[#allocation5 + $0x30] sm:$0xff]  ;;  %s329_s21 = sshll.u32 %s194_s19, 4  ;;  %s919_s7 = scalar_lea.hbm %s970_s2, %s444_s4  ;;  %s914_s21 = int_to_ptr.vmem [resolvable:$true] %s329_s21 }
  0x5e   : > { %v449_v9 = vpack.c.bf16 %v206_v7, %v204_v6  ;;  %v208_v12 = vld [vmem:[#allocation5 + $0x48] sm:$0xff]  ;;  %446 = vmatprep.subr.bf16.mxu0 %v445_v4  ;;  %477 = vmatprep.subr.bf16.mxu1 %v445_v4  ;;  %v210_v13 = vld [vmem:[#allocation5 + $0x58] sm:$0xff]  ;;  %v451_v14 = vpack.c.bf16 %v205_v11, %v203_v10  ;;  %v207_v16 = vld [vmem:[#allocation5 + $0x40] sm:$0xff]  ;;  %s313_s27 = scalar_lea.sflag [#allocation4], %s896_s15  ;;  %s631_s12 = scalar_lea.vmem %s914_s21, 512 }
  0x5f   : > { %448 = vmatpush1.bf16.msra.mxu0 %v447_v8  ;;  %485 = vmatpush1.bf16.msra.mxu1 %v447_v8  ;;  %v453_v15 = vpack.c.bf16 %v210_v13, %v208_v12  ;;  %v209_v17 = vld [vmem:[#allocation5 + $0x50] sm:$0xff]  ;;  %v212_v18 = vld [vmem:[#allocation5 + $0x68] sm:$0xff]  ;;  %v214_v19 = vld [vmem:[#allocation5 + $0x78] sm:$0xff]  ;;  %p632_p4 = scmp.ne.s32.totalorder %s914_s21, %s631_s12  ;;  %s726_s23 = smov [#allocation7]  }
  0x60   : > { %450 = vmatprep.subr.bf16.mxu0 %v449_v9  ;;  %478 = vmatprep.subr.bf16.mxu1 %v449_v9  ;;  %v455_v20 = vpack.c.bf16 %v209_v17, %v207_v16  ;;  %v457_v21 = vpack.c.bf16 %v214_v19, %v212_v18  ;;  %v211_v22 = vld [vmem:[#allocation5 + $0x60] sm:$0xff]  ;;  %v213_v23 = vld [vmem:[#allocation5 + $0x70] sm:$0xff]  ;;  %v216_v24 = vld [vmem:[#allocation5 + $0x88] sm:$0xff]  ;;  %s635_s29 = sshll.u32 %s726_s23, 4  ;;  %s636_s29 = int_to_ptr.vmem [resolvable:$false] %s635_s29 }
  0x61   : > { %v218_v25 = vld [vmem:[#allocation5 + $0x98] sm:$0xff]  ;;  %v459_v26 = vpack.c.bf16 %v213_v23, %v211_v22  ;;  %v215_v28 = vld [vmem:[#allocation5 + $0x80] sm:$0xff]  ;;  %v217_v29 = vld [vmem:[#allocation5 + $0x90] sm:$0xff]  ;;  %p633_p6 = pnand %p632_p4, %p840_p10  ;;  %s637_s30 = scalar_lea.vmem %s636_s29, 1024 }
  0x62   : > { %v461_v27 = vpack.c.bf16 %v218_v25, %v216_v24  ;;  %v220_v30 = vld [vmem:[#allocation5 + $0xa8] sm:$0xff]  ;;  %v222_v31 = vld [vmem:[#allocation5 + $0xb8] sm:$0xff]  ;;  %v463_v32 = vpack.c.bf16 %v217_v29, %v215_v28  ;;  %v219_v34 = vld [vmem:[#allocation5 + $0xa0] sm:$0xff]  ;;  %p638_p12 = scmp.lt.s32.totalorder %s914_s21, %s636_s29  ;;  %p639_p11 = scmp.lt.s32.totalorder %s637_s30, %s631_s12 }
  0x63   : > { %452 = vmatpush1.bf16.msra.mxu0 %v451_v14  ;;  %486 = vmatpush1.bf16.msra.mxu1 %v451_v14  ;;  %v465_v33 = vpack.c.bf16 %v222_v31, %v220_v30  ;;  %v221_v35 = vld [vmem:[#allocation5 + $0xb0] sm:$0xff]  ;;  %v224_v36 = vld [vmem:[#allocation5 + $0xc8] sm:$0xff]  ;;  %v226_v37 = vld [vmem:[#allocation5 + $0xd8] sm:$0xff]  ;;  %p634_p8 = pneg %p633_p6 }
  0x64   : > { %454 = vmatprep.subr.bf16.mxu0 %v453_v15  ;;  %479 = vmatprep.subr.bf16.mxu1 %v453_v15  ;;  %v467_v38 = vpack.c.bf16 %v221_v35, %v219_v34  ;;  %v469_v39 = vpack.c.bf16 %v226_v37, %v224_v36  ;;  %v223_v40 = vld [vmem:[#allocation5 + $0xc0] sm:$0xff]  ;;  %v225_v41 = vld [vmem:[#allocation5 + $0xd0] sm:$0xff]  ;;  %v228_v42 = vld [vmem:[#allocation5 + $0xe8] sm:$0xff]  ;;  %p640_p0 = por %p639_p11, %p638_p12 }
  0x65   : > { %v230_v43 = vld [vmem:[#allocation5 + $0xf8] sm:$0xff]  ;;  %v471_v44 = vpack.c.bf16 %v225_v41, %v223_v40  ;;  %v227_v46 = vld [vmem:[#allocation5 + $0xe0] sm:$0xff]  ;;  %v229_v47 = vld [vmem:[#allocation5 + $0xf0] sm:$0xff] }
  0x66   : > { %v473_v45 = vpack.c.bf16 %v230_v43, %v228_v42  ;;  %v475_v48 = vpack.c.bf16 %v229_v47, %v227_v46  ;;  %v197_v49 = vld [vmem:[%s900_s24] sm:$0xff]  ;;  %v198_v50 = vld [vmem:[%s900_s24 + $0x8] sm:$0xff]  ;;  %p641_p5 = pnand %p640_p0, %p634_p8 }
  0x67   : > { %456 = vmatpush1.bf16.msra.mxu0 %v455_v20  ;;  %487 = vmatpush1.bf16.msra.mxu1 %v455_v20 }
  0x68   : > { %458 = vmatprep.subr.bf16.mxu0 %v457_v21  ;;  %480 = vmatprep.subr.bf16.mxu1 %v457_v21 }
  0x6b   : > { %460 = vmatpush1.bf16.msra.mxu0 %v459_v26  ;;  %488 = vmatpush1.bf16.msra.mxu1 %v459_v26 }
  0x6c   : > { %462 = vmatprep.subr.bf16.mxu0 %v461_v27  ;;  %481 = vmatprep.subr.bf16.mxu1 %v461_v27 }
  0x6f   : > { %464 = vmatpush1.bf16.msra.mxu0 %v463_v32  ;;  %489 = vmatpush1.bf16.msra.mxu1 %v463_v32 }
  0x70   : > { %466 = vmatprep.subr.bf16.mxu0 %v465_v33  ;;  %482 = vmatprep.subr.bf16.mxu1 %v465_v33 }
  0x73   : > { %468 = vmatpush1.bf16.msra.mxu0 %v467_v38  ;;  %490 = vmatpush1.bf16.msra.mxu1 %v467_v38 }
  0x74   : > { %470 = vmatprep.subr.bf16.mxu0 %v469_v39  ;;  %483 = vmatprep.subr.bf16.mxu1 %v469_v39 }
  0x77   : > { %472 = vmatpush1.bf16.msra.mxu0 %v471_v44  ;;  %491 = vmatpush1.bf16.msra.mxu1 %v471_v44 }
  0x78   : > { %474 = vmatprep.subr.bf16.mxu0 %v473_v45  ;;  %484 = vmatprep.subr.bf16.mxu1 %v473_v45 }
  0x7b   : > { %476 = vmatpush1.bf16.msra.mxu0 %v475_v48  ;;  %492 = vmatpush1.bf16.msra.mxu1 %v475_v48 }
  0x7e   : > { %296 = vmatmul.mubr.f32.vlgmr.msra.gmra.mrb[0].mxu0 %v197_v49  ;;  %302 = vmatmul.mubr.f32.vlgmr.msra.gmra.mrb[0].mxu1 %v198_v50 }
 0x151   : > { %v297_v51 = vpop.f32.mrb[0].mxu0  ;;  %v303_v52 = vpop.f32.mrb[0].mxu1 }
 0x152   : > { %308 = vst [vmem:[%s194_s19] sm:$0xff] %v297_v51  ;;  %310 = vst [vmem:[%s194_s19 + $0x10] sm:$0xff] %v303_v52  ;;  %v299_v53 = vpop.f32.mrb[1].mxu0  ;;  %v305_v54 = vpop.f32.mrb[1].mxu1 }
 0x153   : > { %309 = vst [vmem:[%s194_s19 + $0x8] sm:$0xff] %v299_v53  ;;  %311 = vst [vmem:[%s194_s19 + $0x18] sm:$0xff] %v305_v54 }
 0x154   : > { %644 = shalt.err (!%p641_p5)
}
 0x155   : > { %s645_s3 = scalar_lea.hbm %s919_s7, 512  ;;  %s649_s16 = scalar_lea.hbm %s970_s2, 1024 }
 0x156   : > { %p646_p9 = scmp.ne.s32.totalorder %s919_s7, %s645_s3  ;;  %p650_p3 = scmp.lt.u32.totalorder %s919_s7, %s970_s2 }
 0x157   : > { %p651_p7 = scmp.lt.u32.totalorder %s649_s16, %s645_s3  ;;  %p653_p4 = scmp.lt.u32.totalorder %s645_s3, %s919_s7 }
 0x158   : > { %p647_p1 = pnand %p646_p9, %p840_p10 }
 0x159   : > { %p652_p13 = por %p651_p7, %p650_p3 }
 0x15a   : > { %p648_p2 = pneg %p647_p1 }
 0x15b   : > { %p654_p6 = por %p653_p4, %p652_p13 }
 0x15d   : > { %p655_p8 = pnand %p654_p6, %p648_p2 }
 0x15f   : > { %658 = shalt.err (!%p655_p8)
}
 0x160   : > { %s727_s17 = smov 256   ;;  %s728_s19 = smov 16  }
 0x161   : > { %499 = dma.vmem_to_hbm [thread:$0]  (%p840_p10), %s914_s21, 512, %s919_s7, %s313_s27, %s727_s17, %s727_s17, %s728_s19  }
 0x162 PF: > { %s344_s4 = sand.u32 1, %s697_s9   ;;  %p988_p12 = scmp.ne.s32.totalorder %s978_s20, 0 }
 0x163   : > { %p989_p11 = scmp.ge.s32.totalorder %s717_s14, 2  ;;  %s345_s5 = scalar_lea.sflag [#allocation4], %s344_s4 }
 0x165   : > { %p510_p0 = pnand %p989_p11, %p988_p12 }
 0x167   : > { %692 = dma.done.wait (!%p510_p0), %s345_s5, 512  }
 0x168   : > { %694 = vsyncadd (!%p510_p0), %s345_s5, 4294966784  ;;  %s19_s14 = sadd.s32 1, %s717_s14   ;;  %s990_s9 = smov %s701_s10 }
 0x169   : > { %p16_p5 = scmp.ge.s32.totalorder %s19_s14, 4   ;;  %s991_s10 = smov %s705_s11 }
 0x16a   : > { %s992_s11 = smov %s849_s28  ;;  %s993_s12 = smov %s713_s13 }
 0x16b   : > { %s994_s13 = smov %s996_s25  ;;  %18 = sbr.rel (!%p16_p5) target bundleno = 7 (0x7), region = 77 }
 0x172   :  { %350 = vsyncpa [#allocation3], 1 }
 0x173   :  { %352 = vsyncpa [#allocation3 + $0x1], 1 }
 0x174   :  { %353 = vsyncpa [#allocation6], 1 }
 0x175   :  { %354 = vsyncpa [#allocation4], 1 }
 0x176   :  { %356 = vsyncpa [#allocation4 + $0x1], 1 }

</bundles_post_ra>
